<compile_context>
chip_gen: v7x
topology: tpu7x:2x2x1
jax: 0.10.0
libtpu: 0.0.40
codegen_flags: <defaults>
</compile_context>

<pallas_src>
from functools import partial
import math

import numpy as np
import jax
import jax.numpy as jnp
from jax.experimental import pallas as pl
from jax.experimental.pallas import tpu as pltpu

_MIB = 1024 * 1024


# ---------------------------------------------------------------------------
# small helpers
# ---------------------------------------------------------------------------
def _round_up(x, m):
    return ((x + m - 1) // m) * m


def _pad2d(a, rows, cols):
    r, c = a.shape
    if r == rows and c == cols:
        return a
    return jnp.pad(a, ((0, rows - r), (0, cols - c)))


def _largest_tile(dim, target, step=128):
    """Largest multiple of `step` that divides `dim` (dim % step == 0) and is <= target."""
    d = (min(target, dim) // step) * step
    while d > step:
        if dim % d == 0:
            return d
        d -= step
    return step


def _tpu_vmem_and_mxu():
    """(per-core VMEM bytes, MXU tile dim).  Conservative fallbacks if query fails."""
    vmem = 64 * _MIB                  # v7x-safe default
    try:
        vmem = int(pltpu.get_tpu_info().vmem_capacity_bytes)
    except Exception:
        pass
    mxu = 256                         # v6e / v7x
    try:
        kind = jax.devices()[0].device_kind.lower()
        if any(t in kind for t in ("v2", "v3", "v4", "v5")):
            mxu = 128                 # 128x128-tile MXU generations
    except Exception:
        pass
    return vmem, mxu


# ---------------------------------------------------------------------------
# Probe: can constant-index resident blocks be single-buffered (pl.Buffered(1))?
# Saves 2x VMEM on the fused path's weights; fall back silently if unsupported.
# ---------------------------------------------------------------------------
_RESIDENT_MODE_CACHE = {"resolved": False, "mode": None}


def _resident_pipeline_mode():
    if _RESIDENT_MODE_CACHE["resolved"]:
        return _RESIDENT_MODE_CACHE["mode"]
    mode = None
    try:
        def _k(x_ref, o_ref):
            o_ref[...] = x_ref[...] * 2.0

        x = jnp.arange(8 * 128, dtype=jnp.float32).reshape(8, 128)
        out = pl.pallas_call(
            _k,
            out_shape=jax.ShapeDtypeStruct((8, 128), jnp.float32),
            grid=(2,),
            in_specs=[pl.BlockSpec((8, 128), lambda i: (0, 0),
                                   pipeline_mode=pl.Buffered(1))],
            out_specs=pl.BlockSpec((8, 128), lambda i: (0, 0)),
        )(x)
        jax.block_until_ready(out)
        if bool(jnp.allclose(out, 2.0 * x)):
            mode = pl.Buffered(1)
    except Exception:
        mode = None
    _RESIDENT_MODE_CACHE["resolved"] = True
    _RESIDENT_MODE_CACHE["mode"] = mode
    return mode


# ---------------------------------------------------------------------------
# Kernel 1: tiled linear  y = relu_out?( relu_in?(x) @ W + b )
#   grid (M//tm, N//tn, K//tk), f32 accumulator in VMEM scratch.
# ---------------------------------------------------------------------------
def _linear_tiled_kernel(x_ref, w_ref, b_ref, o_ref, acc_ref, *, relu_in, relu_out):
    k = pl.program_id(2)

    @pl.when(k == 0)
    def _():
        acc_ref[...] = jnp.zeros_like(acc_ref)

    x = x_ref[...]
    if relu_in:                        # only the raw-input layer ReLUs here
        x = jnp.maximum(x, 0.0)
    acc_ref[...] += jnp.dot(x, w_ref[...], preferred_element_type=jnp.float32)

    @pl.when(k == pl.num_programs(2) - 1)
    def _():
        y = acc_ref[...] + b_ref[...].astype(jnp.float32)   # f32 epilogue
        if relu_out:                   # ReLU for the *next* layer, applied once here
            y = jnp.maximum(y, 0.0)
        o_ref[...] = y.astype(o_ref.dtype)


def pallas_linear_tiled(x, w, b, *, relu_in=False, relu_out=False,
                        out_dtype=jnp.float32, tm=None, tn=None, tk=None,
                        vmem_limit_bytes=None):
    """x: (M, K); w: (K, N); b: (1, N) f32  ->  (M, N) out_dtype."""
    M, K = x.shape
    Kw, N = w.shape
    assert K == Kw and b.shape == (1, N)

    vmem_bytes, mxu = _tpu_vmem_and_mxu()
    Kp128, Np128 = _round_up(K, 128), _round_up(N, 128)
    # Tiles divide the 128-aligned weight dims so pre-padded weights are never
    # re-padded per call (no HBM->HBM weight copy in the forward pass).
    if tk is None:
        tk = _largest_tile(Kp128, 512)
    if tn is None:
        tn = _largest_tile(Np128, 512 if mxu >= 256 else 128)
    if tm is None:
        Mp128 = _round_up(M, 128)
        tm = Mp128 if Mp128 <= 512 else 256
    if vmem_limit_bytes is None:
        vmem_limit_bytes = min(3 * vmem_bytes // 4, 96 * _MIB)

    Mp, Kp, Np = _round_up(M, tm), _round_up(K, tk), _round_up(N, tn)
    xp = _pad2d(x, Mp, Kp)
    wp = _pad2d(w, Kp, Np)      # no-op when weights were pre-padded at init
    bp = _pad2d(b, 1, Np)

    grid = (Mp // tm, Np // tn, Kp // tk)
    kernel = partial(_linear_tiled_kernel, relu_in=relu_in, relu_out=relu_out)

    flops = 2 * Mp * Kp * Np
    bytes_accessed = int(xp.size * xp.dtype.itemsize
                         + wp.size * wp.dtype.itemsize
                         + bp.size * bp.dtype.itemsize
                         + Mp * Np * np.dtype(out_dtype).itemsize)

    out = pl.pallas_call(
        kernel,
        out_shape=jax.ShapeDtypeStruct((Mp, Np), out_dtype),
        grid_spec=pltpu.PrefetchScalarGridSpec(
            num_scalar_prefetch=0,
            grid=grid,
            in_specs=[
                pl.BlockSpec((tm, tk), lambda i, j, k: (i, k)),
                pl.BlockSpec((tk, tn), lambda i, j, k: (k, j)),
                pl.BlockSpec((1, tn), lambda i, j, k: (0, j)),
            ],
            out_specs=pl.BlockSpec((tm, tn), lambda i, j, k: (i, j)),
            scratch_shapes=[pltpu.VMEM((tm, tn), jnp.float32)],
        ),
        compiler_params=pltpu.CompilerParams(
            dimension_semantics=("parallel", "parallel", "arbitrary"),
            vmem_limit_bytes=int(vmem_limit_bytes),
        ),
        cost_estimate=pl.CostEstimate(flops=int(flops), transcendentals=0,
                                      bytes_accessed=bytes_accessed),
    )(xp, wp, bp)
    return out[:M, :N]


# ---------------------------------------------------------------------------
# Kernel 2: fused MLP stack — grid over batch tiles only, all weights resident.
# ---------------------------------------------------------------------------
def _mlp_fused_kernel(*refs, relu_flags, compute_dtype):
    n_layers = len(relu_flags)
    x_ref = refs[0]
    o_ref = refs[-1]

    h = x_ref[...]                                       # compute_dtype input
    for i in range(n_layers):
        w_ref = refs[1 + 2 * i]
        b_ref = refs[2 + 2 * i]
        xin = h.astype(compute_dtype)                    # narrow before ReLU (commutes)
        if relu_flags[i]:
            xin = jnp.maximum(xin, 0.0)
        h = jnp.dot(xin, w_ref[...], preferred_element_type=jnp.float32)
        h = h + b_ref[...].astype(jnp.float32)           # f32 epilogue
    o_ref[...] = h.astype(o_ref.dtype)


def pallas_mlp_fused(x, layers, *, out_dtype=jnp.float32, tm=128,
                     vmem_limit_bytes=None):
    """x: (M, K0p) compute_dtype; layers: list of (w_pad (Kp,Np), b_pad (1,Np), relu).
    Returns padded output (M, Np_last) f32."""
    M, K0 = x.shape
    assert K0 == layers[0][0].shape[0]
    Mp = _round_up(M, tm)
    xp = _pad2d(x, Mp, K0)

    relu_flags = tuple(l[2] for l in layers)
    compute_dtype = layers[0][0].dtype
    Np_last = layers[-1][0].shape[1]
    resident_mode = _resident_pipeline_mode()            # single-buffer constants if possible

    if vmem_limit_bytes is None:
        vmem_bytes, _ = _tpu_vmem_and_mxu()
        vmem_limit_bytes = min(3 * vmem_bytes // 4, 96 * _MIB)

    in_specs = [pl.BlockSpec((tm, K0), lambda i: (i, 0))]
    operands = [xp]
    flops = 0
    bytes_accessed = int(xp.size * xp.dtype.itemsize
                         + Mp * Np_last * np.dtype(out_dtype).itemsize)
    for (w_pad, b_pad, _relu) in layers:
        Kp, Np = w_pad.shape
        if resident_mode is not None:
            in_specs.append(pl.BlockSpec((Kp, Np), lambda i: (0, 0),
                                         pipeline_mode=resident_mode))
            in_specs.append(pl.BlockSpec((1, Np), lambda i: (0, 0),
                                         pipeline_mode=resident_mode))
        else:
            in_specs.append(pl.BlockSpec((Kp, Np), lambda i: (0, 0)))
            in_specs.append(pl.BlockSpec((1, Np), lambda i: (0, 0)))
        operands += [w_pad, b_pad]
        flops += 2 * Mp * Kp * Np
        bytes_accessed += int(w_pad.size * w_pad.dtype.itemsize
                              + b_pad.size * b_pad.dtype.itemsize)

    kernel = partial(_mlp_fused_kernel, relu_flags=relu_flags,
                     compute_dtype=compute_dtype)

    out = pl.pallas_call(
        kernel,
        out_shape=jax.ShapeDtypeStruct((Mp, Np_last), out_dtype),
        grid_spec=pltpu.PrefetchScalarGridSpec(
            num_scalar_prefetch=0,
            grid=(Mp // tm,),
            in_specs=in_specs,
            out_specs=pl.BlockSpec((tm, Np_last), lambda i: (i, 0)),
        ),
        compiler_params=pltpu.CompilerParams(
            dimension_semantics=("parallel",),
            vmem_limit_bytes=int(vmem_limit_bytes),
        ),
        cost_estimate=pl.CostEstimate(flops=int(flops), transcendentals=0,
                                      bytes_accessed=int(bytes_accessed)),
    )(*operands)
    return out[:M, :]


# ---------------------------------------------------------------------------
# MLP module (parameter setup + dispatch is plain-JAX glue)
# ---------------------------------------------------------------------------
class MLP:
    """
    layer_sizes[0] is the dimension of the input
    layer_sizes[-1] is the dimension of the output
    """

    def __init__(self, layer_sizes, final_relu=False, *, key,
                 compute_dtype=jnp.bfloat16, pad_multiple=128,
                 fused_vmem_budget_bytes=None):
        layer_sizes = [int(s) for s in layer_sizes]
        num_layers = len(layer_sizes) - 1
        final_relu_layer = num_layers if final_relu else num_layers - 1

        self.compute_dtype = compute_dtype
        self.in_features = layer_sizes[0]
        self.out_features = layer_sizes[-1]
        self.layers = []       # (w_pad (Kp,Np) compute_dtype, b_pad (1,Np) f32, relu)
        self.layers_f32 = []   # unpadded f32 params, for the reference

        weight_bytes = 0
        for i in range(num_layers):
            in_size, out_size = layer_sizes[i], layer_sizes[i + 1]
            key, kw, kb = jax.random.split(key, 3)
            # PyTorch nn.Linear default init: U(-1/sqrt(in), 1/sqrt(in))
            bound = 1.0 / math.sqrt(in_size)
            w = jax.random.uniform(kw, (out_size, in_size), jnp.float32,
                                   minval=-bound, maxval=bound)
            b = jax.random.uniform(kb, (out_size,), jnp.float32,
                                   minval=-bound, maxval=bound)
            relu = i < final_relu_layer

            w_io = jnp.asarray(w.T)            # (in, out) so kernel does x @ W
            b_row = b.reshape(1, -1)
            self.layers_f32.append((w_io, b_row, relu))

            Kp = _round_up(in_size, pad_multiple)
            Np = _round_up(out_size, pad_multiple)
            w_pad = _pad2d(w_io, Kp, Np).astype(compute_dtype)
            b_pad = _pad2d(b_row, 1, Np)       # bias stays f32
            self.layers.append((w_pad, b_pad, relu))
            weight_bytes += int(w_pad.size) * w_pad.dtype.itemsize
            weight_bytes += int(b_pad.size) * b_pad.dtype.itemsize
        self._weight_bytes = weight_bytes

        # Generation-aware VMEM budgets (v5e/v6e: 128 MiB physical, v7x: 64 MiB).
        vmem_bytes, self._mxu = _tpu_vmem_and_mxu()
        self._vmem_limit = min(3 * vmem_bytes // 4, 96 * _MIB)
        self._resident_bufs = 1 if _resident_pipeline_mode() is not None else 2
        if fused_vmem_budget_bytes is None:
            fused_vmem_budget_bytes = max(
                min(self._vmem_limit - 8 * _MIB, vmem_bytes // 2), 0)
        self._fused_budget = fused_vmem_budget_bytes
        self._use_fused = self._fused_residency_bytes(128) <= self._fused_budget

    # buffer-count-adjusted VMEM footprint of the fused kernel for batch tile tm
    def _fused_residency_bytes(self, tm):
        itemsize_c = jnp.dtype(self.compute_dtype).itemsize
        K0p = self.layers[0][0].shape[0]
        Np_last = self.layers[-1][0].shape[1]
        max_w = max(max(w.shape) for (w, _, _) in self.layers)
        total = self._weight_bytes * self._resident_bufs   # resident weights/biases
        total += 2 * tm * K0p * itemsize_c                 # input double buffer
        total += 2 * tm * Np_last * 4                      # f32 output double buffer
        total += tm * max_w * (4 + itemsize_c)             # live layer intermediates
        return total

    def _choose_fused_tm(self, M):
        Mp128 = _round_up(M, 128)
        cap = max(128, (Mp128 // 2) // 128 * 128)  # prefer >=2 grid steps (megacore)
        for tm in (512, 384, 256, 128):
            if tm != 128 and tm > min(Mp128, cap):
                continue
            if self._fused_residency_bytes(tm) <= self._fused_budget:
                return tm
        return 128

    def __call__(self, x):
        lead = x.shape[:-1]
        x2 = x.reshape(-1, x.shape[-1]).astype(self.compute_dtype)
        M = x2.shape[0]
        K0p = self.layers[0][0].shape[0]
        xp = _pad2d(x2, M, K0p)                    # zero-pad features (exact)

        if self._use_fused:
            tm = self._choose_fused_tm(M)
            out_pad = pallas_mlp_fused(xp, self.layers, tm=tm,
                                       vmem_limit_bytes=self._vmem_limit)
            out = out_pad[:, :self.out_features]
        else:
            # TODO(synk): add a middle tier (activations resident, oversized weights
            # streamed via pltpu.emit_pipeline) for v7x heads that overflow 64 MiB.
            n = len(self.layers)
            Mp128 = _round_up(M, 128)
            tm = Mp128 if Mp128 <= 512 else 256
            h = _pad2d(xp, _round_up(M, tm), K0p)
            for idx, (w_pad, b_pad, relu) in enumerate(self.layers):
                relu_in = relu and idx == 0                       # ReLU on the raw input
                relu_out = (idx + 1 < n) and self.layers[idx + 1][2]
                last = idx == n - 1
                h = pallas_linear_tiled(
                    h, w_pad, b_pad,
                    relu_in=relu_in, relu_out=relu_out,
                    out_dtype=(jnp.float32 if last else self.compute_dtype),
                    tm=tm, vmem_limit_bytes=self._vmem_limit)
            out = h[:M, :self.out_features]
        return out.reshape(*lead, self.out_features)


# ---------------------------------------------------------------------------
# Pure-jnp reference (mirrors the bf16-in / f32-accumulate numerics)
# ---------------------------------------------------------------------------
def mlp_reference(mlp, x):
    h = x.reshape(-1, x.shape[-1]).astype(jnp.float32)
    for (w, b, relu) in mlp.layers_f32:
        if relu:
            h = jnp.maximum(h, 0.0)
        h = jnp.dot(h.astype(mlp.compute_dtype), w.astype(mlp.compute_dtype),
                    preferred_element_type=jnp.float32) + b
    return h.reshape(*x.shape[:-1], mlp.out_features)


if __name__ == "__main__":
    key = jax.random.PRNGKey(0)
    k_param, k_param2, k_x, k_lin = jax.random.split(key, 4)

    layer_sizes = [32, 64, 48, 16]
    batch = 8
    x = jax.random.normal(k_x, (batch, layer_sizes[0]), jnp.float32)

    # 1) fused whole-stack kernel (weights resident in VMEM)
    mlp = MLP(layer_sizes, final_relu=False, key=k_param)
    assert mlp._use_fused
    out = jax.block_until_ready(mlp(x))
    ref = mlp_reference(mlp, x)
    assert out.shape == (batch, layer_sizes[-1])
    assert jnp.allclose(out, ref, atol=1e-2, rtol=1e-2), "fused MLP mismatch"

    # 2) per-layer tiled kernel path (forced), with final_relu=True
    mlp2 = MLP(layer_sizes, final_relu=True, key=k_param2,
               fused_vmem_budget_bytes=0)
    assert not mlp2._use_fused
    out2 = jax.block_until_ready(mlp2(x))
    ref2 = mlp_reference(mlp2, x)
    assert out2.shape == (batch, layer_sizes[-1])
    assert jnp.allclose(out2, ref2, atol=1e-2, rtol=1e-2), "tiled MLP mismatch"

    # 3) tiled linear kernel directly, at non-tile-multiple sizes (padding path)
    M, K, N = 160, 200, 176
    kx, kw, kb = jax.random.split(k_lin, 3)
    xl = jax.random.normal(kx, (M, K), jnp.float32).astype(jnp.bfloat16)
    wl = (jax.random.normal(kw, (K, N), jnp.float32) * 0.05).astype(jnp.bfloat16)
    bl = jax.random.normal(kb, (1, N), jnp.float32) * 0.05
    yl = jax.block_until_ready(
        pallas_linear_tiled(xl, wl, bl, relu_in=True, out_dtype=jnp.float32))
    yref = jnp.dot(jnp.maximum(xl, 0.0), wl,
                   preferred_element_type=jnp.float32) + bl
    assert jnp.allclose(yl, yref, atol=1e-2, rtol=1e-2), "tiled linear mismatch"

    print("KERNEL_OK")
</pallas_src>

<mosaic_0001>
module attributes {stable_mosaic.version = 11 : i64} {
  func.func @_k(%arg0: i32, %arg1: memref<8x128xf32, #tpu.memory_space<vmem>>, %arg2: memref<8x128xf32, #tpu.memory_space<vmem>>) attributes {dimension_semantics = [#tpu.dimension_semantics<arbitrary>], iteration_bounds = array<i64: 2>, scalar_prefetch = 0 : i64, scratch_operands = 0 : i64, tpu.core_type = #tpu.core_type<tc>, window_params = [{pipeline_mode = #tpu.pipeline_mode<synchronous>, transform_indices = @transform_0, window_bounds = array<i64: 8, 128>}, {pipeline_mode = #tpu.pipeline_mode<synchronous>, transform_indices = @transform_1, window_bounds = array<i64: 8, 128>}]} {
    %c0 = arith.constant 0 : index
    %c0_0 = arith.constant 0 : index
    %0 = vector.load %arg1[%c0, %c0_0] : memref<8x128xf32, #tpu.memory_space<vmem>>, vector<8x128xf32>
    %cst = arith.constant 2.000000e+00 : f32
    %1 = vector.broadcast %cst : f32 to vector<8x128xf32>
    %2 = arith.mulf %0, %1 : vector<8x128xf32>
    %c0_1 = arith.constant 0 : index
    %c0_2 = arith.constant 0 : index
    %3 = vector.load %arg2[%c0_1, %c0_2] : memref<8x128xf32, #tpu.memory_space<vmem>>, vector<8x128xf32>
    tpu.vector_store %arg2[%c0_1, %c0_2], %2 {strides = array<i32>} : memref<8x128xf32, #tpu.memory_space<vmem>>, vector<8x128xf32>,
    return
  }
  func.func @transform_0(%arg0: i32) -> (i32, i32) {
    %c0_i32 = arith.constant 0 : i32
    %c0_i32_0 = arith.constant 0 : i32
    %c0_i32_1 = arith.constant 0 : i32
    return %c0_i32, %c0_i32_0 : i32, i32
  }
  func.func @transform_1(%arg0: i32) -> (i32, i32) {
    %c0_i32 = arith.constant 0 : i32
    %c0_i32_0 = arith.constant 0 : i32
    %c0_i32_1 = arith.constant 0 : i32
    return %c0_i32, %c0_i32_0 : i32, i32
  }
}

module attributes {stable_mosaic.version = 11 : i64} {
  func.func @_mlp_fused_kernel(%arg0: i32, %arg1: memref<128x128xbf16, #tpu.memory_space<vmem>>, %arg2: memref<128x128xbf16, #tpu.memory_space<vmem>>, %arg3: memref<1x128xf32, #tpu.memory_space<vmem>>, %arg4: memref<128x128xbf16, #tpu.memory_space<vmem>>, %arg5: memref<1x128xf32, #tpu.memory_space<vmem>>, %arg6: memref<128x128xbf16, #tpu.memory_space<vmem>>, %arg7: memref<1x128xf32, #tpu.memory_space<vmem>>, %arg8: memref<128x128xf32, #tpu.memory_space<vmem>>) attributes {dimension_semantics = [#tpu.dimension_semantics<parallel>], iteration_bounds = array<i64: 1>, scalar_prefetch = 0 : i64, scratch_operands = 0 : i64, tpu.core_type = #tpu.core_type<tc>, window_params = [{transform_indices = @transform_0, window_bounds = array<i64: 128, 128>}, {pipeline_mode = #tpu.pipeline_mode<synchronous>, transform_indices = @transform_1, window_bounds = array<i64: 128, 128>}, {pipeline_mode = #tpu.pipeline_mode<synchronous>, transform_indices = @transform_2, window_bounds = array<i64: 1, 128>}, {pipeline_mode = #tpu.pipeline_mode<synchronous>, transform_indices = @transform_3, window_bounds = array<i64: 128, 128>}, {pipeline_mode = #tpu.pipeline_mode<synchronous>, transform_indices = @transform_4, window_bounds = array<i64: 1, 128>}, {pipeline_mode = #tpu.pipeline_mode<synchronous>, transform_indices = @transform_5, window_bounds = array<i64: 128, 128>}, {pipeline_mode = #tpu.pipeline_mode<synchronous>, transform_indices = @transform_6, window_bounds = array<i64: 1, 128>}, {transform_indices = @transform_7, window_bounds = array<i64: 128, 128>}]} {
    %c0 = arith.constant 0 : index
    %c0_0 = arith.constant 0 : index
    %0 = vector.load %arg1[%c0, %c0_0] : memref<128x128xbf16, #tpu.memory_space<vmem>>, vector<128x128xbf16>
    %cst = arith.constant 0.000000e+00 : bf16
    %1 = vector.broadcast %cst : bf16 to vector<128x128xbf16>
    %2 = arith.maximumf %0, %1 : vector<128x128xbf16>
    %c0_1 = arith.constant 0 : index
    %c0_2 = arith.constant 0 : index
    %3 = vector.load %arg2[%c0_1, %c0_2] : memref<128x128xbf16, #tpu.memory_space<vmem>>, vector<128x128xbf16>
    %cst_3 = arith.constant dense<0.000000e+00> : vector<128x128xf32>
    %4 = tpu.matmul %2, %3, %cst_3 {dimension_numbers = #tpu.dot_dimension_numbers<[1], [0], [0], [1], [0, 0, 1, 1], [], []>} : vector<128x128xbf16>, vector<128x128xbf16>, vector<128x128xf32> -> vector<128x128xf32>
    %c0_4 = arith.constant 0 : index
    %c0_5 = arith.constant 0 : index
    %5 = vector.load %arg3[%c0_4, %c0_5] : memref<1x128xf32, #tpu.memory_space<vmem>>, vector<1x128xf32>
    %6 = vector.broadcast %5 : vector<1x128xf32> to vector<128x128xf32>
    %7 = arith.addf %4, %6 : vector<128x128xf32>
    %8 = arith.truncf %7 : vector<128x128xf32> to vector<128x128xbf16>
    %cst_6 = arith.constant 0.000000e+00 : bf16
    %9 = vector.broadcast %cst_6 : bf16 to vector<128x128xbf16>
    %10 = arith.maximumf %8, %9 : vector<128x128xbf16>
    %c0_7 = arith.constant 0 : index
    %c0_8 = arith.constant 0 : index
    %11 = vector.load %arg4[%c0_7, %c0_8] : memref<128x128xbf16, #tpu.memory_space<vmem>>, vector<128x128xbf16>
    %cst_9 = arith.constant dense<0.000000e+00> : vector<128x128xf32>
    %12 = tpu.matmul %10, %11, %cst_9 {dimension_numbers = #tpu.dot_dimension_numbers<[1], [0], [0], [1], [0, 0, 1, 1], [], []>} : vector<128x128xbf16>, vector<128x128xbf16>, vector<128x128xf32> -> vector<128x128xf32>
    %c0_10 = arith.constant 0 : index
    %c0_11 = arith.constant 0 : index
    %13 = vector.load %arg5[%c0_10, %c0_11] : memref<1x128xf32, #tpu.memory_space<vmem>>, vector<1x128xf32>
    %14 = vector.broadcast %13 : vector<1x128xf32> to vector<128x128xf32>
    %15 = arith.addf %12, %14 : vector<128x128xf32>
    %16 = arith.truncf %15 : vector<128x128xf32> to vector<128x128xbf16>
    %c0_12 = arith.constant 0 : index
    %c0_13 = arith.constant 0 : index
    %17 = vector.load %arg6[%c0_12, %c0_13] : memref<128x128xbf16, #tpu.memory_space<vmem>>, vector<128x128xbf16>
    %cst_14 = arith.constant dense<0.000000e+00> : vector<128x128xf32>
    %18 = tpu.matmul %16, %17, %cst_14 {dimension_numbers = #tpu.dot_dimension_numbers<[1], [0], [0], [1], [0, 0, 1, 1], [], []>} : vector<128x128xbf16>, vector<128x128xbf16>, vector<128x128xf32> -> vector<128x128xf32>
    %c0_15 = arith.constant 0 : index
    %c0_16 = arith.constant 0 : index
    %19 = vector.load %arg7[%c0_15, %c0_16] : memref<1x128xf32, #tpu.memory_space<vmem>>, vector<1x128xf32>
    %20 = vector.broadcast %19 : vector<1x128xf32> to vector<128x128xf32>
    %21 = arith.addf %18, %20 : vector<128x128xf32>
    %c0_17 = arith.constant 0 : index
    %c0_18 = arith.constant 0 : index
    %22 = vector.load %arg8[%c0_17, %c0_18] : memref<128x128xf32, #tpu.memory_space<vmem>>, vector<128x128xf32>
    tpu.vector_store %arg8[%c0_17, %c0_18], %21 {strides = array<i32>} : memref<128x128xf32, #tpu.memory_space<vmem>>, vector<128x128xf32>,
    return
  }
  func.func @transform_0(%arg0: i32) -> (i32, i32) {
    %c0_i32 = arith.constant 0 : i32
    %c0_i32_0 = arith.constant 0 : i32
    return %arg0, %c0_i32 : i32, i32
  }
  func.func @transform_1(%arg0: i32) -> (i32, i32) {
    %c0_i32 = arith.constant 0 : i32
    %c0_i32_0 = arith.constant 0 : i32
    %c0_i32_1 = arith.constant 0 : i32
    return %c0_i32, %c0_i32_0 : i32, i32
  }
  func.func @transform_2(%arg0: i32) -> (i32, i32) {
    %c0_i32 = arith.constant 0 : i32
    %c0_i32_0 = arith.constant 0 : i32
    %c0_i32_1 = arith.constant 0 : i32
    return %c0_i32, %c0_i32_0 : i32, i32
  }
  func.func @transform_3(%arg0: i32) -> (i32, i32) {
    %c0_i32 = arith.constant 0 : i32
    %c0_i32_0 = arith.constant 0 : i32
    %c0_i32_1 = arith.constant 0 : i32
    return %c0_i32, %c0_i32_0 : i32, i32
  }
  func.func @transform_4(%arg0: i32) -> (i32, i32) {
    %c0_i32 = arith.constant 0 : i32
    %c0_i32_0 = arith.constant 0 : i32
    %c0_i32_1 = arith.constant 0 : i32
    return %c0_i32, %c0_i32_0 : i32, i32
  }
  func.func @transform_5(%arg0: i32) -> (i32, i32) {
    %c0_i32 = arith.constant 0 : i32
    %c0_i32_0 = arith.constant 0 : i32
    %c0_i32_1 = arith.constant 0 : i32
    return %c0_i32, %c0_i32_0 : i32, i32
  }
  func.func @transform_6(%arg0: i32) -> (i32, i32) {
    %c0_i32 = arith.constant 0 : i32
    %c0_i32_0 = arith.constant 0 : i32
    %c0_i32_1 = arith.constant 0 : i32
    return %c0_i32, %c0_i32_0 : i32, i32
  }
  func.func @transform_7(%arg0: i32) -> (i32, i32) {
    %c0_i32 = arith.constant 0 : i32
    %c0_i32_0 = arith.constant 0 : i32
    return %arg0, %c0_i32 : i32, i32
  }
}

</mosaic_0001>

<bundles_post_ra>
// kernel: tpu_custom_call.1
= control target key start
LH: loop header
LB: loop body
LE: loop exit
PB: predicated region body
PF: predicated region fallthrough
CT: control target
= control target key end

     0   :  { %6 = vsyncpa [#allocation3], 0  ;;  %s341_s0 = inlined_call_operand.hbm [shape: f32[8,128], index: 0, kind: input, shape index: {}]   ;;  %s342_s1 = inlined_call_operand.hbm [shape: f32[8,128], index: 1, kind: output, shape index: {}]  }
   0x1   :  { %7 = vsyncpa [#allocation4], 0  ;;  %s262_s6 = smov 0  }
   0x2 LB: > { %s145_s7 = sadd.s32 4294967295, %s248_s6   ;;  %p146_p0 = scmp.ge.s32.totalorder %s248_s6, 1  ;;  %s248_s6 = sphi %s262_s6, %s13_s6  }
   0x3   : > { %p60_p1 = scmp.lt.s32.totalorder %s248_s6, 3  ;;  %p276_p3 = scmp.eq.s32.totalorder %s145_s7, 0 }
   0x4   : > { %s250_s10 = smov [#allocation2]   ;;  %s180_s15 = scalar_lea.hbm %s341_s0, 128 }
   0x5   : > { %p270_p2 = pnand %p146_p0, %p60_p1  ;;  %s73_s11 = sshll.u32 %s250_s10, 4  ;;  %s74_s11 = int_to_ptr.vmem [resolvable:$true] %s73_s11 }
   0x6   : > { %s347_s9 = scalar_select %p276_p3, 1, 0 }
   0x7   : > { %s346_s8 = scalar_select %p270_p2, 1, 0 }
   0x8   : > { %p162_p4 = pneg %p270_p2  ;;  %p181_p6 = scmp.ne.s32.totalorder %s341_s0, %s180_s15 }
   0x9   : > { %p187_p10 = scmp.lt.u32.totalorder %s180_s15, %s341_s0 }
   0xa   : > { %p284_p5 = pnand %p276_p3, %p162_p4 }
   0xc   : > { %p182_p7 = pneg %p284_p5 }
   0xe   : > { %p183_p8 = pnand %p182_p7, %p181_p6 }
  0x10   : > { %p184_p9 = pneg %p183_p8 }
  0x12   : > { %p189_p11 = pnand %p187_p10, %p184_p9 }
  0x14   : > { %192 = shalt.err (!%p189_p11)
}
  0x15   : > { %s193_s20 = scalar_lea.vmem %s74_s11, 128  ;;  %p201_p1 = scmp.lt.s32.totalorder %s74_s11, %s74_s11 }
  0x16   : > { %p194_p12 = scmp.ne.s32.totalorder %s74_s11, %s193_s20  ;;  %p202_p4 = scmp.lt.s32.totalorder %s193_s20, %s193_s20 }
  0x18   : > { %p196_p13 = pnand %p194_p12, %p182_p7  ;;  %p203_p3 = por %p202_p4, %p201_p1 }
  0x1a   : > { %p197_p0 = pneg %p196_p13 }
  0x1c   : > { %p204_p2 = pnand %p203_p3, %p197_p0 }
  0x1e   : > { %207 = shalt.err (!%p204_p2)
}
  0x1f   : > { %165 = dma.hbm_to_vmem [thread:$0]  (!%p284_p5), %s341_s0, 128, %s74_s11, [#allocation3]  }
  0x20   : > { %p349_p6 = scmp.ne.s32.totalorder %s346_s8, 0 }
  0x21   : > { %p350_p8 = scmp.ne.s32.totalorder (!%p349_p6), %s347_s9, 0 }
  0x22   : > { %86 = sbr.rel (%p349_p6) target bundleno = 67 (0x43), region = 24 }
  0x29   : > { %239 = dma.done.wait (%p350_p8), [#allocation3], 128  }
  0x2a   : > { %241 = vsyncadd (%p350_p8), [#allocation3], 4294967168  ;;  %s251_s23 = smov [#allocation5]   ;;  %v96_v0 = vld [vmem:[#allocation2] sm:$0xff]  ;;  %p312_p2 = scmp.eq.s32.totalorder %s145_s7, 1 }
  0x2b   : > { %s106_s24 = sshll.u32 %s251_s23, 4  ;;  %v97_v1 = vmul.f32 2.0, %v96_v0  ;;  %s107_s24 = int_to_ptr.vmem [resolvable:$true] %s106_s24 }
  0x2c   : > { %s208_s26 = scalar_lea.vmem %s107_s24, 128  ;;  %p215_p9 = scmp.lt.s32.totalorder %s107_s24, %s107_s24 }
  0x2d   : > { %98 = vst [vmem:[#allocation5] sm:$0xff] %v97_v1  ;;  %p209_p3 = scmp.ne.s32.totalorder %s107_s24, %s208_s26  ;;  %p216_p10 = scmp.lt.s32.totalorder %s208_s26, %s208_s26 }
  0x2f   : > { %p210_p5 = pnand %p209_p3, %p312_p2  ;;  %p217_p11 = por %p216_p10, %p215_p9 }
  0x31   : > { %p211_p7 = pneg %p210_p5 }
  0x33   : > { %p218_p12 = pnand %p217_p11, %p211_p7 }
  0x35   : > { %221 = shalt.err (!%p218_p12)
}
  0x36   : > { %s222_s29 = scalar_lea.hbm %s342_s1, 128 }
  0x37   : > { %p223_p13 = scmp.ne.s32.totalorder %s342_s1, %s222_s29  ;;  %p228_p4 = scmp.lt.u32.totalorder %s222_s29, %s342_s1 }
  0x39   : > { %p224_p0 = pnand %p223_p13, %p312_p2 }
  0x3b   : > { %p225_p1 = pneg %p224_p0 }
  0x3d   : > { %p230_p6 = pnand %p228_p4, %p225_p1 }
  0x3f   : > { %233 = shalt.err (!%p230_p6)
}
  0x40   : > { %159 = dma.vmem_to_hbm [thread:$0]  (%p312_p2), %s107_s24, 128, %s342_s1, [#allocation4]  }
  0x41   : > { %243 = dma.done.wait (%p312_p2), [#allocation4], 128  }
  0x42   : > { %245 = vsyncadd (%p312_p2), [#allocation4], 4294967168 }
  0x43 PF: > { %s13_s6 = sadd.s32 1, %s248_s6  }
  0x44   : > { %p10_p8 = scmp.ge.s32.totalorder %s13_s6, 4  }
  0x46   :  { %12 = sbr.rel (!%p10_p8) target bundleno = 2 (0x2), region = 53 }
  0x4d   :  { %119 = vsyncpa [#allocation3], 1 }
  0x4e   :  { %121 = vsyncpa [#allocation3 + $0x1], 1 }
  0x4f   :  { %122 = vsyncpa [#allocation4], 1 }
  0x50   :  { %124 = vsyncpa [#allocation4 + $0x1], 1 }

// kernel: tpu_custom_call.1
= control target key start
LH: loop header
LB: loop body
LE: loop exit
PB: predicated region body
PF: predicated region fallthrough
CT: control target
= control target key end

     0   :  { %12 = vsyncpa [#allocation3], 0  ;;  %s1254_s0 = inlined_call_operand.hbm [shape: bf16[128,128], index: 0, kind: input, shape index: {}]   ;;  %s1255_s1 = inlined_call_operand.hbm [shape: bf16[128,128], index: 1, kind: input, shape index: {}]   ;;  %s1256_s2 = inlined_call_operand.vmem [shape: f32[1,128], index: 2, kind: input, shape index: {}]   ;;  %s1257_s3 = inlined_call_operand.hbm [shape: bf16[128,128], index: 3, kind: input, shape index: {}]   ;;  %s1258_s4 = inlined_call_operand.vmem [shape: f32[1,128], index: 4, kind: input, shape index: {}]   ;;  %s1259_s5 = inlined_call_operand.hbm [shape: bf16[128,128], index: 5, kind: input, shape index: {}]   ;;  %s1260_s6 = inlined_call_operand.vmem [shape: f32[1,128], index: 6, kind: input, shape index: {}]   ;;  %s1261_s7 = inlined_call_operand.hbm [shape: f32[128,128], index: 7, kind: output, shape index: {}]  }
   0x1   :  { %13 = vsyncpa [#allocation6], 0 }
   0x2   :  { %14 = vsyncpa [#allocation9], 0 }
   0x3   :  { %15 = vsyncpa [#allocation4], 0  ;;  %s1073_s24 = smov [#allocation5]   ;;  %s1074_s26 = smov [#allocation2]  }
   0x4   :  { %s33_s25 = sshll.u32 %s1073_s24, 4  ;;  %s21_s27 = sshll.u32 %s1074_s26, 4  ;;  %s34_s25 = int_to_ptr.vmem [resolvable:$true] %s33_s25  ;;  %s1123_s27 = int_to_ptr.vmem [resolvable:$true] %s21_s27 }
   0x5   :  { %s955_s30 = scalar_lea.hbm %s1255_s1, 1024 }
   0x6   :  { %p956_p0 = scmp.ne.s32.totalorder %s1255_s1, %s955_s30  ;;  %p959_p1 = scmp.lt.u32.totalorder %s955_s30, %s1255_s1 }
   0x8   :  { %p961_p2 = pnand %p959_p1, %p956_p0 }
   0xa   :  { %964 = shalt.err (!%p961_p2)
}
   0xb   :  { %s965_s12 = scalar_lea.vmem %s34_s25, 1024  ;;  %p970_p4 = scmp.lt.s32.totalorder %s34_s25, %s34_s25 }
   0xc   :  { %p966_p3 = scmp.ne.s32.totalorder %s34_s25, %s965_s12  ;;  %p971_p5 = scmp.lt.s32.totalorder %s965_s12, %s965_s12 }
   0xe   :  { %p972_p6 = por %p971_p5, %p970_p4 }
  0x10   :  { %p973_p7 = pnand %p972_p6, %p966_p3 }
  0x12   :  { %976 = shalt.err (!%p973_p7)
}
  0x13   :  { %s1075_s13 = smov 64   ;;  %s1076_s14 = smov 4  }
  0x14   :  { %39 = dma.hbm_to_vmem [thread:$0]  %s1255_s1, 1024, %s34_s25, [#allocation6], %s1075_s13, %s1075_s13, %s1076_s14  }
  0x15   :  { %s977_s19 = scalar_lea.hbm %s1254_s0, 1024 }
  0x16   :  { %p978_p8 = scmp.ne.s32.totalorder %s1254_s0, %s977_s19  ;;  %p981_p9 = scmp.lt.u32.totalorder %s977_s19, %s1254_s0 }
  0x18   :  { %p983_p10 = pnand %p981_p9, %p978_p8 }
  0x1a   :  { %986 = shalt.err (!%p983_p10)
}
  0x1b   :  { %s987_s24 = scalar_lea.vmem %s1123_s27, 1024  ;;  %p992_p12 = scmp.lt.s32.totalorder %s1123_s27, %s1123_s27 }
  0x1c   :  { %p988_p11 = scmp.ne.s32.totalorder %s1123_s27, %s987_s24  ;;  %p993_p13 = scmp.lt.s32.totalorder %s987_s24, %s987_s24 }
  0x1e   :  { %p994_p0 = por %p993_p13, %p992_p12 }
  0x20   :  { %p995_p1 = pnand %p994_p0, %p988_p11 }
  0x22   :  { %998 = shalt.err (!%p995_p1)
}
  0x23   :  { %27 = dma.hbm_to_vmem [thread:$0]  %s1254_s0, 1024, %s1123_s27, [#allocation3], %s1075_s13, %s1075_s13, %s1076_s14  }
  0x24   :  { %s1077_s26 = smov [#allocation7]   ;;  %s1078_s29 = smov [#allocation8]  }
  0x25   :  { %s47_s28 = sshll.u32 %s1077_s26, 4  ;;  %s61_s30 = sshll.u32 %s1078_s29, 4  ;;  %s48_s28 = int_to_ptr.vmem [resolvable:$true] %s47_s28  ;;  %s1160_s30 = int_to_ptr.vmem [resolvable:$true] %s61_s30 }
  0x26   :  { %s999_s10 = scalar_lea.hbm %s1257_s3, 1024 }
  0x27   :  { %p1000_p2 = scmp.ne.s32.totalorder %s1257_s3, %s999_s10  ;;  %p1003_p3 = scmp.lt.u32.totalorder %s999_s10, %s1257_s3 }
  0x29   :  { %p1005_p4 = pnand %p1003_p3, %p1000_p2 }
  0x2b   :  { %1008 = shalt.err (!%p1005_p4)
}
  0x2c   :  { %s1009_s0 = scalar_lea.vmem %s48_s28, 1024  ;;  %p1014_p6 = scmp.lt.s32.totalorder %s48_s28, %s48_s28 }
  0x2d   :  { %p1010_p5 = scmp.ne.s32.totalorder %s48_s28, %s1009_s0  ;;  %p1015_p7 = scmp.lt.s32.totalorder %s1009_s0, %s1009_s0 }
  0x2f   :  { %p1016_p8 = por %p1015_p7, %p1014_p6 }
  0x31   :  { %p1017_p9 = pnand %p1016_p8, %p1010_p5 }
  0x33   :  { %1020 = shalt.err (!%p1017_p9)
}
  0x34   :  { %53 = dma.hbm_to_vmem [thread:$0]  %s1257_s3, 1024, %s48_s28, [#allocation6], %s1075_s13, %s1075_s13, %s1076_s14  }
  0x35   :  { %s1021_s20 = scalar_lea.hbm %s1259_s5, 1024 }
  0x36   :  { %p1022_p10 = scmp.ne.s32.totalorder %s1259_s5, %s1021_s20  ;;  %p1025_p11 = scmp.lt.u32.totalorder %s1021_s20, %s1259_s5 }
  0x38   :  { %p1027_p12 = pnand %p1025_p11, %p1022_p10 }
  0x3a   :  { %1030 = shalt.err (!%p1027_p12)
}
  0x3b   :  { %s1031_s1 = scalar_lea.vmem %s1160_s30, 1024  ;;  %p1036_p0 = scmp.lt.s32.totalorder %s1160_s30, %s1160_s30 }
  0x3c   :  { %p1032_p13 = scmp.ne.s32.totalorder %s1160_s30, %s1031_s1  ;;  %p1037_p1 = scmp.lt.s32.totalorder %s1031_s1, %s1031_s1 }
  0x3e   :  { %p1038_p2 = por %p1037_p1, %p1036_p0 }
  0x40   :  { %p1039_p3 = pnand %p1038_p2, %p1032_p13 }
  0x42   :  { %1042 = shalt.err (!%p1039_p3)
}
  0x43   :  { %67 = dma.hbm_to_vmem [thread:$0]  %s1259_s5, 1024, %s1160_s30, [#allocation9], %s1075_s13, %s1075_s13, %s1076_s14  }
  0x44   :  { %1065 = dma.done.wait [#allocation3], 1024  }
  0x45   :  { %1066 = vsyncadd [#allocation3], 4294966272 }
  0x46   :  { %1067 = dma.done.wait [#allocation6], 2048  }
  0x47   :  { %1068 = vsyncadd [#allocation6], 4294965248 }
  0x48   :  { %1069 = dma.done.wait [#allocation9], 1024  }
  0x49   :  { %1070 = vsyncadd [#allocation9], 4294966272  ;;  %v931_v0 = vld [vmem:[#allocation5] sm:$0xff]   ;;  %v932_v1 = vld [vmem:[#allocation5 + $0x8] sm:$0xff]   ;;  %v1079_v6 = vmov 0  }
  0x4a   :  { %809 = vmatprep.subr.bf16.mxu0 %v931_v0  ;;  %v933_v2 = vld [vmem:[#allocation5 + $0x10] sm:$0xff]   ;;  %v934_v3 = vld [vmem:[#allocation5 + $0x18] sm:$0xff]   ;;  %v83_v4 = vld [vmem:[#allocation2] sm:$0xf] }
  0x4b   :  { %810 = vmatpush3.bf16.msra.mxu0 %v931_v0  ;;  %v84_v5 = vld [vmem:[#allocation2 + $0x4] sm:$0xf]  ;;  %v99_v7 = vmax.bf16 %v1079_v6, %v83_v4  ;;  %v940_v12 = vld [vmem:[#allocation7 + $0x8] sm:$0xff]   ;;  %v941_v14 = vld [vmem:[#allocation7 + $0x10] sm:$0xff]  }
  0x4c   :  { %811 = vmatprep.subr.bf16.mxu0 %v932_v1  ;;  %v100_v8 = vmax.bf16 %v1079_v6, %v84_v5  ;;  %v935_v10 = vld [vmem:[#allocation5 + $0x20] sm:$0xff]   ;;  %v936_v13 = vld [vmem:[#allocation5 + $0x28] sm:$0xff]   ;;  %v937_v15 = vld [vmem:[#allocation5 + $0x30] sm:$0xff]  }
  0x4d   :  { %v939_v11 = vld [vmem:[#allocation7] sm:$0xff]   ;;  %v942_v16 = vld [vmem:[#allocation7 + $0x18] sm:$0xff]   ;;  %v85_v17 = vld [vmem:[#allocation2 + $0x8] sm:$0xf] }
  0x4e   :  { %v727_v9 = vcombine.low %v99_v7, %v100_v8  ;;  %841 = vmatprep.subr.bf16.mxu1 %v939_v11  ;;  %v86_v18 = vld [vmem:[#allocation2 + $0xc] sm:$0xf]  ;;  %v938_v19 = vld [vmem:[#allocation5 + $0x38] sm:$0xff]   ;;  %v87_v20 = vld [vmem:[#allocation2 + $0x10] sm:$0xf]  ;;  %v101_v22 = vmax.bf16 %v1079_v6, %v85_v17 }
  0x4f   :  { %812 = vmatpush3.bf16.msra.mxu0 %v932_v1  ;;  %842 = vmatpush3.bf16.msra.mxu1 %v939_v11  ;;  %v88_v21 = vld [vmem:[#allocation2 + $0x14] sm:$0xf]  ;;  %v102_v23 = vmax.bf16 %v1079_v6, %v86_v18  ;;  %v943_v24 = vld [vmem:[#allocation7 + $0x20] sm:$0xff]   ;;  %v103_v25 = vmax.bf16 %v1079_v6, %v87_v20  ;;  %v944_v28 = vld [vmem:[#allocation7 + $0x28] sm:$0xff]  }
  0x50   :  { %813 = vmatprep.subr.bf16.mxu0 %v933_v2  ;;  %825 = vmatprep.mubr.bf16.mxu0 %v727_v9  ;;  %v104_v26 = vmax.bf16 %v1079_v6, %v88_v21  ;;  %v89_v30 = vld [vmem:[#allocation2 + $0x18] sm:$0xf]  ;;  %v90_v31 = vld [vmem:[#allocation2 + $0x1c] sm:$0xf]  ;;  %v91_v32 = vld [vmem:[#allocation2 + $0x20] sm:$0xf] }
  0x51   :  { %843 = vmatprep.subr.bf16.mxu1 %v940_v12  ;;  %v728_v27 = vcombine.low %v101_v22, %v102_v23  ;;  %v92_v33 = vld [vmem:[#allocation2 + $0x24] sm:$0xf]  ;;  %v105_v34 = vmax.bf16 %v1079_v6, %v89_v30  ;;  %v106_v35 = vmax.bf16 %v1079_v6, %v90_v31  ;;  %v107_v36 = vmax.bf16 %v1079_v6, %v91_v32  ;;  %v93_v40 = vld [vmem:[#allocation2 + $0x28] sm:$0xf]  ;;  %v94_v41 = vld [vmem:[#allocation2 + $0x2c] sm:$0xf] }
  0x52   :  { %v729_v29 = vcombine.low %v103_v25, %v104_v26  ;;  %v108_v37 = vmax.bf16 %v1079_v6, %v92_v33  ;;  %v95_v42 = vld [vmem:[#allocation2 + $0x30] sm:$0xf]  ;;  %v96_v43 = vld [vmem:[#allocation2 + $0x34] sm:$0xf]  ;;  %v109_v44 = vmax.bf16 %v1079_v6, %v93_v40  ;;  %v110_v45 = vmax.bf16 %v1079_v6, %v94_v41  ;;  %v97_v50 = vld [vmem:[#allocation2 + $0x38] sm:$0xf] }
  0x53   :  { %814 = vmatpush3.bf16.msra.mxu0 %v933_v2  ;;  %844 = vmatpush3.bf16.msra.mxu1 %v940_v12  ;;  %v730_v38 = vcombine.low %v105_v34, %v106_v35  ;;  %v111_v46 = vmax.bf16 %v1079_v6, %v95_v42  ;;  %v112_v47 = vmax.bf16 %v1079_v6, %v96_v43  ;;  %v98_v51 = vld [vmem:[#allocation2 + $0x3c] sm:$0xf]  ;;  %v945_v55 = vld [vmem:[#allocation7 + $0x30] sm:$0xff]   ;;  %v947_v57 = vld [vmem:[#allocation8] sm:$0xff]  }
  0x54   :  { %815 = vmatprep.subr.bf16.mxu0 %v934_v3  ;;  %845 = vmatprep.subr.bf16.mxu1 %v941_v14  ;;  %v731_v39 = vcombine.low %v107_v36, %v108_v37  ;;  %v732_v48 = vcombine.low %v109_v44, %v110_v45  ;;  %v113_v52 = vmax.bf16 %v1079_v6, %v97_v50  ;;  %v946_v56 = vld [vmem:[#allocation7 + $0x38] sm:$0xff]   ;;  %v948_v58 = vld [vmem:[#allocation8 + $0x8] sm:$0xff]   ;;  %v949_v59 = vld [vmem:[#allocation8 + $0x10] sm:$0xff]  }
  0x55   :  { %v733_v49 = vcombine.low %v111_v46, %v112_v47  ;;  %v114_v53 = vmax.bf16 %v1079_v6, %v98_v51  ;;  %v950_v60 = vld [vmem:[#allocation8 + $0x18] sm:$0xff]   ;;  %v1213_v61 = vld [vmem:[#allocation8 + $0x20] sm:$0xff]   ;;  %v1216_v62 = vld [vmem:[#allocation8 + $0x28] sm:$0xff]  }
  0x56   :  { %v726_v0 = vld [vmem:[%s1256_s2] ss:$0 sm:$0xff]  ;;  %v954_v50 = vld [vmem:[#allocation8 + $0x38] sm:$0xff]  }
  0x57   :  { %816 = vmatpush3.bf16.msra.mxu0 %v934_v3  ;;  %846 = vmatpush3.bf16.msra.mxu1 %v941_v14  ;;  %v734_v54 = vcombine.low %v113_v52, %v114_v53  ;;  %v743_v52 = vld [vmem:[%s1258_s4] ss:$0 sm:$0xff] }
  0x58   :  { %817 = vmatprep.subr.bf16.mxu0 %v935_v10  ;;  %847 = vmatprep.subr.bf16.mxu1 %v942_v16 }
  0x5b   :  { %818 = vmatpush3.bf16.msra.mxu0 %v935_v10  ;;  %848 = vmatpush3.bf16.msra.mxu1 %v942_v16 }
  0x5c   :  { %819 = vmatprep.subr.bf16.mxu0 %v936_v13  ;;  %849 = vmatprep.subr.bf16.mxu1 %v943_v24 }
  0x5f   :  { %820 = vmatpush3.bf16.msra.mxu0 %v936_v13  ;;  %850 = vmatpush3.bf16.msra.mxu1 %v943_v24 }
  0x60   :  { %821 = vmatprep.subr.bf16.mxu0 %v937_v15  ;;  %851 = vmatprep.subr.bf16.mxu1 %v944_v28 }
  0x63   :  { %822 = vmatpush3.bf16.msra.mxu0 %v937_v15  ;;  %852 = vmatpush3.bf16.msra.mxu1 %v944_v28 }
  0x64   :  { %823 = vmatprep.subr.bf16.mxu0 %v938_v19  ;;  %853 = vmatprep.subr.bf16.mxu1 %v945_v55 }
  0x67   :  { %824 = vmatpush3.bf16.msra.mxu0 %v938_v19  ;;  %854 = vmatpush3.bf16.msra.mxu1 %v945_v55 }
  0x68   :  { %855 = vmatprep.subr.bf16.mxu1 %v946_v56  ;;  %873 = vmatprep.subr.bf16.mxu0 %v947_v57 }
  0x6a   :  { %826 = vmatmul.mubr.bf16.vlgmr.msra.gmra.mrb[0].mxu0 %v728_v27 }
  0x6b   :  { %829 = vmatprep.mubr.bf16.mxu0 %v729_v29  ;;  %856 = vmatpush3.bf16.msra.mxu1 %v946_v56 }
  0x6c   :  { %905 = vmatprep.subr.bf16.mxu1 %v947_v57  ;;  %874 = vmatpush3.bf16.msra.mxu0 %v947_v57 }
  0x6d   :  { %875 = vmatprep.subr.bf16.mxu0 %v948_v58 }
  0x70   :  { %876 = vmatpush3.bf16.msra.mxu0 %v948_v58 }
  0x71   :  { %877 = vmatprep.subr.bf16.mxu0 %v949_v59 }
  0x72   :  { %830 = vmatmul.mubr.bf16.gmra.mrb[4].mxu0 %v730_v38 }
  0x73   :  { %833 = vmatprep.mubr.bf16.mxu0 %v731_v39 }
  0x74   :  { %878 = vmatpush3.bf16.msra.mxu0 %v949_v59 }
  0x75   :  { %879 = vmatprep.subr.bf16.mxu0 %v950_v60 }
  0x78   :  { %880 = vmatpush3.bf16.msra.mxu0 %v950_v60 }
  0x79   :  { %881 = vmatprep.subr.bf16.mxu0 %v1213_v61 }
  0x7a   :  { %834 = vmatmul.mubr.bf16.gmra.mrb[8].mxu0 %v732_v48 }
  0x7b   :  { %837 = vmatprep.mubr.bf16.mxu0 %v733_v49  ;;  %v953_v49 = vld [vmem:[#allocation8 + $0x30] sm:$0xff]  }
  0x7c   :  { %882 = vmatpush3.bf16.msra.mxu0 %v1213_v61 }
  0x7d   :  { %883 = vmatprep.subr.bf16.mxu0 %v1216_v62 }
  0x80   :  { %884 = vmatpush3.bf16.msra.mxu0 %v1216_v62 }
  0x81   :  { %885 = vmatprep.subr.bf16.mxu0 %v953_v49 }
  0x82   :  { %838 = vmatmul.mubr.bf16.gmra.mrb[12].mxu0 %v734_v54 }
  0x84   :  { %886 = vmatpush3.bf16.msra.mxu0 %v953_v49 }
  0x85   :  { %887 = vmatprep.subr.bf16.mxu0 %v954_v50 }
  0x88   :  { %888 = vmatpush3.bf16.msra.mxu0 %v954_v50 }
 0x13d   :  { %v827_v63 = vpop.f32.mrb[0].mxu0 }
 0x13e   :  { %v268_v1 = vpop.f32.mrb[1].mxu0  ;;  %v277_v3 = vadd.f32 %v827_v63, %v726_v0 }
 0x13f   :  { %v828_v2 = vpop.f32.mrb[2].mxu0  ;;  %v269_v7 = vadd.f32 %v726_v0, %v268_v1 }
 0x140   :  { %v280_v4 = vadd.f32 %v828_v2, %v726_v0  ;;  %v271_v5 = vpop.f32.mrb[3].mxu0 }
 0x141   :  { %v272_v8 = vadd.f32 %v726_v0, %v271_v5 }
 0x142   :  { %v332_v9 = vpack.c.bf16 %v280_v4, %v277_v3 }
 0x143   :  { %v331_v10 = vpack.c.bf16 %v272_v8, %v269_v7 }
 0x144   :  { %v340_v14 = vmax.bf16 %v1079_v6, %v332_v9 }
 0x145   :  { %v831_v11 = vpop.f32.mrb[4].mxu0  ;;  %v339_v12 = vmax.bf16 %v1079_v6, %v331_v10 }
 0x146   :  { %v284_v13 = vpop.f32.mrb[5].mxu0  ;;  %v293_v16 = vadd.f32 %v831_v11, %v726_v0 }
 0x147   :  { %v832_v15 = vpop.f32.mrb[6].mxu0  ;;  %857 = vmatprep.mubr.bf16.mxu1 %v339_v12  ;;  %v285_v19 = vadd.f32 %v726_v0, %v284_v13 }
 0x148   :  { %v296_v17 = vadd.f32 %v832_v15, %v726_v0  ;;  %v287_v18 = vpop.f32.mrb[7].mxu0  ;;  %858 = vmatmul.mubr.bf16.vlgmr.msra.gmra.mrb[0].mxu1 %v340_v14 }
 0x149   :  { %v288_v20 = vadd.f32 %v726_v0, %v287_v18  ;;  %913 = vmatpush3.bf16.msra.mxu1 %v947_v57 }
 0x14a   :  { %v334_v21 = vpack.c.bf16 %v296_v17, %v293_v16  ;;  %906 = vmatprep.subr.bf16.mxu1 %v948_v58 }
 0x14b   :  { %v333_v22 = vpack.c.bf16 %v288_v20, %v285_v19 }
 0x14c   :  { %v342_v26 = vmax.bf16 %v1079_v6, %v334_v21 }
 0x14d   :  { %v835_v23 = vpop.f32.mrb[8].mxu0  ;;  %v341_v24 = vmax.bf16 %v1079_v6, %v333_v22  ;;  %914 = vmatpush3.bf16.msra.mxu1 %v948_v58 }
 0x14e   :  { %v300_v25 = vpop.f32.mrb[9].mxu0  ;;  %907 = vmatprep.subr.bf16.mxu1 %v949_v59  ;;  %v309_v28 = vadd.f32 %v835_v23, %v726_v0 }
 0x14f   :  { %v836_v27 = vpop.f32.mrb[10].mxu0  ;;  %861 = vmatprep.mubr.bf16.mxu1 %v341_v24  ;;  %v301_v31 = vadd.f32 %v726_v0, %v300_v25 }
 0x150   :  { %v312_v29 = vadd.f32 %v836_v27, %v726_v0  ;;  %v303_v30 = vpop.f32.mrb[11].mxu0  ;;  %862 = vmatmul.mubr.bf16.gmra.mrb[4].mxu1 %v342_v26 }
 0x151   :  { %v304_v32 = vadd.f32 %v726_v0, %v303_v30  ;;  %915 = vmatpush3.bf16.msra.mxu1 %v949_v59 }
 0x152   :  { %v336_v33 = vpack.c.bf16 %v312_v29, %v309_v28  ;;  %908 = vmatprep.subr.bf16.mxu1 %v950_v60  ;;  %v752_v28 = vld [vmem:[%s1260_s6] ss:$0 sm:$0xff]  ;;  %s1080_s6 = smov [#allocation10]  }
 0x153   :  { %v335_v34 = vpack.c.bf16 %v304_v32, %v301_v31  ;;  %s712_s28 = sshll.u32 %s1080_s6, 4  ;;  %s713_s28 = int_to_ptr.vmem [resolvable:$true] %s712_s28 }
 0x154   :  { %v344_v38 = vmax.bf16 %v1079_v6, %v336_v33  ;;  %s1043_s29 = scalar_lea.vmem %s713_s28, 2048  ;;  %p1048_p5 = scmp.lt.s32.totalorder %s713_s28, %s713_s28 }
 0x155   :  { %v839_v35 = vpop.f32.mrb[12].mxu0  ;;  %v343_v36 = vmax.bf16 %v1079_v6, %v335_v34  ;;  %916 = vmatpush3.bf16.msra.mxu1 %v950_v60  ;;  %p1044_p4 = scmp.ne.s32.totalorder %s713_s28, %s1043_s29  ;;  %p1049_p6 = scmp.lt.s32.totalorder %s1043_s29, %s1043_s29 }
 0x156   :  { %v316_v37 = vpop.f32.mrb[13].mxu0  ;;  %909 = vmatprep.subr.bf16.mxu1 %v1213_v61  ;;  %v325_v40 = vadd.f32 %v839_v35, %v726_v0 }
 0x157   :  { %v840_v39 = vpop.f32.mrb[14].mxu0  ;;  %865 = vmatprep.mubr.bf16.mxu1 %v343_v36  ;;  %v317_v43 = vadd.f32 %v726_v0, %v316_v37  ;;  %p1050_p7 = por %p1049_p6, %p1048_p5 }
 0x158   :  { %v328_v41 = vadd.f32 %v840_v39, %v726_v0  ;;  %v319_v42 = vpop.f32.mrb[15].mxu0  ;;  %866 = vmatmul.mubr.bf16.gmra.mrb[8].mxu1 %v344_v38 }
 0x159   :  { %v320_v44 = vadd.f32 %v726_v0, %v319_v42  ;;  %917 = vmatpush3.bf16.msra.mxu1 %v1213_v61  ;;  %p1051_p8 = pnand %p1050_p7, %p1044_p4 }
 0x15a   :  { %v338_v45 = vpack.c.bf16 %v328_v41, %v325_v40  ;;  %910 = vmatprep.subr.bf16.mxu1 %v1216_v62 }
 0x15b   :  { %v337_v46 = vpack.c.bf16 %v320_v44, %v317_v43 }
 0x15c   :  { %v346_v48 = vmax.bf16 %v1079_v6, %v338_v45 }
 0x15d   :  { %v345_v47 = vmax.bf16 %v1079_v6, %v337_v46  ;;  %918 = vmatpush3.bf16.msra.mxu1 %v1216_v62 }
 0x15e   :  { %911 = vmatprep.subr.bf16.mxu1 %v953_v49 }
 0x15f   :  { %869 = vmatprep.mubr.bf16.mxu1 %v345_v47 }
 0x160   :  { %870 = vmatmul.mubr.bf16.gmra.mrb[12].mxu1 %v346_v48 }
 0x161   :  { %919 = vmatpush3.bf16.msra.mxu1 %v953_v49 }
 0x162   :  { %912 = vmatprep.subr.bf16.mxu1 %v954_v50 }
 0x165   :  { %920 = vmatpush3.bf16.msra.mxu1 %v954_v50 }
 0x21b   :  { %v859_v51 = vpop.f32.mrb[0].mxu1 }
 0x21c   :  { %v452_v53 = vpop.f32.mrb[1].mxu1  ;;  %v461_v6 = vadd.f32 %v859_v51, %v743_v52 }
 0x21d   :  { %v860_v54 = vpop.f32.mrb[2].mxu1  ;;  %v453_v57 = vadd.f32 %v743_v52, %v452_v53 }
 0x21e   :  { %v464_v55 = vadd.f32 %v860_v54, %v743_v52  ;;  %v455_v56 = vpop.f32.mrb[3].mxu1 }
 0x21f   :  { %v456_v58 = vadd.f32 %v743_v52, %v455_v56 }
 0x220   :  { %v516_v59 = vpack.c.bf16 %v464_v55, %v461_v6 }
 0x221   :  { %v515_v60 = vpack.c.bf16 %v456_v58, %v453_v57 }
 0x223   :  { %v863_v61 = vpop.f32.mrb[4].mxu1  ;;  %889 = vmatprep.mubr.bf16.mxu0 %v515_v60 }
 0x224   :  { %v468_v62 = vpop.f32.mrb[5].mxu1  ;;  %890 = vmatmul.mubr.bf16.vlgmr.msra.gmra.mrb[16].mxu0 %v516_v59  ;;  %v477_v0 = vadd.f32 %v863_v61, %v743_v52 }
 0x225   :  { %v864_v63 = vpop.f32.mrb[6].mxu1  ;;  %v469_v3 = vadd.f32 %v743_v52, %v468_v62 }
 0x226   :  { %v480_v1 = vadd.f32 %v864_v63, %v743_v52  ;;  %v471_v2 = vpop.f32.mrb[7].mxu1 }
 0x227   :  { %v472_v4 = vadd.f32 %v743_v52, %v471_v2 }
 0x228   :  { %v518_v5 = vpack.c.bf16 %v480_v1, %v477_v0 }
 0x229   :  { %v517_v7 = vpack.c.bf16 %v472_v4, %v469_v3 }
 0x22b   :  { %v867_v8 = vpop.f32.mrb[8].mxu1  ;;  %893 = vmatprep.mubr.bf16.mxu0 %v517_v7 }
 0x22c   :  { %v484_v9 = vpop.f32.mrb[9].mxu1  ;;  %894 = vmatmul.mubr.bf16.gmra.mrb[20].mxu0 %v518_v5  ;;  %v493_v11 = vadd.f32 %v867_v8, %v743_v52 }
 0x22d   :  { %v868_v10 = vpop.f32.mrb[10].mxu1  ;;  %v485_v14 = vadd.f32 %v743_v52, %v484_v9 }
 0x22e   :  { %v496_v12 = vadd.f32 %v868_v10, %v743_v52  ;;  %v487_v13 = vpop.f32.mrb[11].mxu1 }
 0x22f   :  { %v488_v15 = vadd.f32 %v743_v52, %v487_v13 }
 0x230   :  { %v520_v16 = vpack.c.bf16 %v496_v12, %v493_v11 }
 0x231   :  { %v519_v17 = vpack.c.bf16 %v488_v15, %v485_v14 }
 0x233   :  { %v871_v18 = vpop.f32.mrb[12].mxu1  ;;  %897 = vmatprep.mubr.bf16.mxu1 %v519_v17 }
 0x234   :  { %v500_v19 = vpop.f32.mrb[13].mxu1  ;;  %898 = vmatmul.mubr.bf16.vlgmr.msra.gmra.mrb[16].mxu1 %v520_v16  ;;  %v509_v21 = vadd.f32 %v871_v18, %v743_v52 }
 0x235   :  { %v872_v20 = vpop.f32.mrb[14].mxu1  ;;  %v501_v24 = vadd.f32 %v743_v52, %v500_v19 }
 0x236   :  { %v512_v22 = vadd.f32 %v872_v20, %v743_v52  ;;  %v503_v23 = vpop.f32.mrb[15].mxu1 }
 0x237   :  { %v504_v25 = vadd.f32 %v743_v52, %v503_v23 }
 0x238   :  { %v522_v26 = vpack.c.bf16 %v512_v22, %v509_v21 }
 0x239   :  { %v521_v27 = vpack.c.bf16 %v504_v25, %v501_v24 }
 0x23b   :  { %901 = vmatprep.mubr.bf16.mxu1 %v521_v27 }
 0x23c   :  { %902 = vmatmul.mubr.bf16.gmra.mrb[20].mxu1 %v522_v26 }
 0x2f7   :  { %v891_v29 = vpop.f32.mrb[16].mxu0 }
 0x2f8   :  { %v637_v30 = vadd.f32 %v891_v29, %v752_v28  ;;  %v628_v31 = vpop.f32.mrb[17].mxu0 }
 0x2f9   :  { %v629_v32 = vadd.f32 %v752_v28, %v628_v31  ;;  %v892_v33 = vpop.f32.mrb[18].mxu0 }
 0x2fa   :  { %693 = vst [vmem:[#allocation10 + $0x10] sm:$0xff] %v637_v30  ;;  %v640_v34 = vadd.f32 %v892_v33, %v752_v28  ;;  %v631_v35 = vpop.f32.mrb[19].mxu0 }
 0x2fb   :  { %691 = vst [vmem:[#allocation10] sm:$0xff] %v629_v32  ;;  %v632_v36 = vadd.f32 %v752_v28, %v631_v35 }
 0x2fc   :  { %694 = vst [vmem:[#allocation10 + $0x18] sm:$0xff] %v640_v34 }
 0x2fd   :  { %692 = vst [vmem:[#allocation10 + $0x8] sm:$0xff] %v632_v36 }
 0x2ff   :  { %v895_v37 = vpop.f32.mrb[20].mxu0 }
 0x300   :  { %v653_v38 = vadd.f32 %v895_v37, %v752_v28  ;;  %v644_v39 = vpop.f32.mrb[21].mxu0 }
 0x301   :  { %v645_v40 = vadd.f32 %v752_v28, %v644_v39  ;;  %v896_v41 = vpop.f32.mrb[22].mxu0 }
 0x302   :  { %697 = vst [vmem:[#allocation10 + $0x30] sm:$0xff] %v653_v38  ;;  %v656_v42 = vadd.f32 %v896_v41, %v752_v28  ;;  %v647_v43 = vpop.f32.mrb[23].mxu0 }
 0x303   :  { %695 = vst [vmem:[#allocation10 + $0x20] sm:$0xff] %v645_v40  ;;  %v648_v44 = vadd.f32 %v752_v28, %v647_v43 }
 0x304   :  { %698 = vst [vmem:[#allocation10 + $0x38] sm:$0xff] %v656_v42 }
 0x305   :  { %696 = vst [vmem:[#allocation10 + $0x28] sm:$0xff] %v648_v44 }
 0x307   :  { %v899_v45 = vpop.f32.mrb[16].mxu1 }
 0x308   :  { %v669_v46 = vadd.f32 %v899_v45, %v752_v28  ;;  %v660_v47 = vpop.f32.mrb[17].mxu1 }
 0x309   :  { %v661_v48 = vadd.f32 %v752_v28, %v660_v47  ;;  %v900_v49 = vpop.f32.mrb[18].mxu1 }
 0x30a   :  { %701 = vst [vmem:[#allocation10 + $0x50] sm:$0xff] %v669_v46  ;;  %v672_v50 = vadd.f32 %v900_v49, %v752_v28  ;;  %v663_v51 = vpop.f32.mrb[19].mxu1 }
 0x30b   :  { %699 = vst [vmem:[#allocation10 + $0x40] sm:$0xff] %v661_v48  ;;  %v664_v52 = vadd.f32 %v752_v28, %v663_v51 }
 0x30c   :  { %702 = vst [vmem:[#allocation10 + $0x58] sm:$0xff] %v672_v50 }
 0x30d   :  { %700 = vst [vmem:[#allocation10 + $0x48] sm:$0xff] %v664_v52 }
 0x30f   :  { %v903_v53 = vpop.f32.mrb[20].mxu1 }
 0x310   :  { %v685_v54 = vadd.f32 %v903_v53, %v752_v28  ;;  %v676_v6 = vpop.f32.mrb[21].mxu1 }
 0x311   :  { %v677_v55 = vadd.f32 %v752_v28, %v676_v6  ;;  %v904_v56 = vpop.f32.mrb[22].mxu1 }
 0x312   :  { %705 = vst [vmem:[#allocation10 + $0x70] sm:$0xff] %v685_v54  ;;  %v688_v57 = vadd.f32 %v904_v56, %v752_v28  ;;  %v679_v58 = vpop.f32.mrb[23].mxu1 }
 0x313   :  { %703 = vst [vmem:[#allocation10 + $0x60] sm:$0xff] %v677_v55  ;;  %v680_v59 = vadd.f32 %v752_v28, %v679_v58 }
 0x314   :  { %706 = vst [vmem:[#allocation10 + $0x78] sm:$0xff] %v688_v57 }
 0x315   :  { %704 = vst [vmem:[#allocation10 + $0x68] sm:$0xff] %v680_v59 }
 0x316   :  { %1054 = shalt.err (!%p1051_p8)
}
 0x317   :  { %s1055_s9 = scalar_lea.hbm %s1261_s7, 2048 }
 0x318   :  { %p1056_p9 = scmp.ne.s32.totalorder %s1261_s7, %s1055_s9  ;;  %p1059_p10 = scmp.lt.u32.totalorder %s1055_s9, %s1261_s7 }
 0x31a   :  { %p1061_p11 = pnand %p1059_p10, %p1056_p9 }
 0x31c   :  { %1064 = shalt.err (!%p1061_p11)
}
 0x31d   :  { %s1081_s16 = smov 128   ;;  %s1082_s0 = smov 8  }
 0x31e   :  { %718 = dma.vmem_to_hbm [thread:$0]  %s713_s28, 2048, %s1261_s7, [#allocation4], %s1081_s16, %s1081_s16, %s1082_s0  }
 0x31f   :  { %1071 = dma.done.wait [#allocation4], 2048  }
 0x320   :  { %1072 = vsyncadd [#allocation4], 4294965248 }
 0x321   :  { %722 = vsyncpa [#allocation3], 1 }
 0x322   :  { %723 = vsyncpa [#allocation6], 1 }
 0x323   :  { %724 = vsyncpa [#allocation9], 1 }
 0x324   :  { %725 = vsyncpa [#allocation4], 1 }

</bundles_post_ra>
